<compile_context>
chip_gen: v7x
topology: tpu7x:2x2x1
jax: 0.10.0
libtpu: 0.0.40
codegen_flags: <defaults>
</compile_context>

<pallas_src>
import functools

import jax
import jax.numpy as jnp
from jax.experimental import pallas as pl
from jax.experimental.pallas import tpu as pltpu

LEAKY_SLOPE = 0.01            # nn.LeakyReLU default negative_slope
BN_EPS = 1e-5                 # nn.BatchNorm2d default eps
MATMUL_DTYPE = jnp.bfloat16   # MXU operand dtype (f32 accumulation)


def _double_conv_bn_kernel(x_ref,                     # (Mp, W*Cin)      bf16 flat H-halo rows
                           w1_ref,                    # (3*W*Cin, W*Cout) bf16 fused Toeplitz
                           g1_ref, be1_ref,           # (1, Cout) f32
                           w2_ref,                    # (3*W*Cout, W*Cout) bf16 fused Toeplitz
                           g2_ref, be2_ref,           # (1, Cout) f32
                           s_ref,                     # (W*Cout, Cout) f32 channel selector
                           m_ref,                     # (M, 1) f32 valid-row mask
                           o_ref,                     # (M, W*Cout) f32 lane-dense output slab
                           *, inv_cnt):
    M, Lout = o_ref.shape
    Cout = g1_ref.shape[-1]
    W = Lout // Cout
    # Hoisted broadcast (reused 4x): 1 on real data rows, 0 on batch-boundary junk rows.
    mask = jnp.broadcast_to(m_ref[...], (M, Lout))

    def conv_fused(padf, w_ref):
        # padf: (M+2, L) bf16 flat rows with zero halo rows (per-batch halos are the masked junk
        # rows; the W halo lives inside the Toeplitz weight).  One im2row lane-concat of the three
        # contiguous shifted row slices, then a single K = 3*L GEMM on the MXU.
        stage = jnp.concatenate([padf[0:M], padf[1:M + 1], padf[2:M + 2]], axis=1)  # (M, 3L) bf16
        return jnp.dot(stage, w_ref[...], preferred_element_type=jnp.float32)        # (M, Lout) f32

    def bn_lrelu(acc, g_ref, b_ref):
        # One-pass train-mode batch stats per channel via a single stacked stats GEMM:
        # [acc*mask ; (acc*mask)*acc] @ selector  ->  (2M, Cout); junk rows contribute zero.
        acc_m = acc * mask
        st = jnp.dot(jnp.concatenate([acc_m, acc_m * acc], axis=0), s_ref[...],
                     preferred_element_type=jnp.float32)            # (2M, Cout)
        mean = jnp.sum(st[:M], axis=0, keepdims=True) * inv_cnt     # (1, Cout)
        msq = jnp.sum(st[M:], axis=0, keepdims=True) * inv_cnt      # (1, Cout)
        var = jnp.maximum(msq - mean * mean, 0.0)
        scale = g_ref[...] * jax.lax.rsqrt(var + BN_EPS)            # (1, Cout)
        shift = b_ref[...] - mean * scale                           # (1, Cout)
        ss = jnp.tile(jnp.concatenate([scale, shift], axis=0), (1, W))   # (2, Lout), tiled once
        y = acc * ss[0:1, :] + ss[1:2, :]
        y = jnp.maximum(y, LEAKY_SLOPE * y)                         # LeakyReLU: mul + max only
        # Re-mask: junk rows -> exact zeros (they are the next conv's H-halo rows).
        return y * mask

    # ---- layer 1: conv1 (one fused GEMM) + bn1 + leaky_relu ----
    y1 = bn_lrelu(conv_fused(x_ref[...], w1_ref), g1_ref, be1_ref)          # (M, Lout) f32

    # ---- layer 2: re-pad flat rows with one zero halo row at each end (bf16 staging) ----
    zrow = jnp.zeros((1, Lout), MATMUL_DTYPE)
    padf2 = jnp.concatenate([zrow, y1.astype(MATMUL_DTYPE), zrow], axis=0)  # (M+2, Lout) bf16
    o_ref[...] = bn_lrelu(conv_fused(padf2, w2_ref), g2_ref, be2_ref)


def _pack_toeplitz(w, W):
    """(Cout, Cin, 3, 3) PyTorch conv weight -> (3*W*Cin, W*Cout) fused block-Toeplitz matrix.

    Row index = ky*(W*Cin) + wi*Cin + ci (ky-major, matching the in-kernel im2row lane concat);
    the three kx taps and the width-boundary zero padding are encoded inside the matrix, so the
    3x3 conv becomes ONE dense GEMM over lane-folded flat rows.
    NOTE: only 3/W dense — fine for tiny Cin/W (this demo); use per-kx GEMMs at production scale.
    """
    c_out, c_in = w.shape[0], w.shape[1]
    kx = jnp.arange(3)[:, None, None]
    wi = jnp.arange(W)[None, :, None]
    wo = jnp.arange(W)[None, None, :]
    sel = (wi == wo + kx - 1).astype(w.dtype)              # (3, W, W)
    wt = jnp.einsum("xiw,ocyx->yicwo", sel, w)             # (3, W, Cin, W, Cout)
    return wt.reshape(3 * W * c_in, W * c_out)


def init_params(key, in_ch, out_ch):
    """Deterministic params mirroring double_conv_bn.__init__ (conv biases kept for the reference;
    the kernel omits them because train-mode BN cancels them exactly)."""
    ks = jax.random.split(key, 8)
    w1 = 0.1 * jax.random.normal(ks[0], (out_ch, in_ch, 3, 3), jnp.float32)
    b1 = 0.1 * jax.random.normal(ks[1], (out_ch,), jnp.float32)
    g1 = 1.0 + 0.1 * jax.random.normal(ks[2], (out_ch,), jnp.float32)
    be1 = 0.1 * jax.random.normal(ks[3], (out_ch,), jnp.float32)
    w2 = 0.1 * jax.random.normal(ks[4], (out_ch, out_ch, 3, 3), jnp.float32)
    b2 = 0.1 * jax.random.normal(ks[5], (out_ch,), jnp.float32)
    g2 = 1.0 + 0.1 * jax.random.normal(ks[6], (out_ch,), jnp.float32)
    be2 = 0.1 * jax.random.normal(ks[7], (out_ch,), jnp.float32)
    return dict(w1=w1, b1=b1, g1=g1, be1=be1, w2=w2, b2=b2, g2=g2, be2=be2)


@jax.jit
def double_conv_bn_forward(x_nchw, params):
    x = jnp.transpose(x_nchw, (0, 2, 3, 1)).astype(jnp.float32)        # NCHW -> NHWC
    N, H, W, Cin = x.shape
    Cout = params["w1"].shape[0]
    Lin, Lout = W * Cin, W * Cout
    Hp = H + 2
    Mp = N * Hp                 # flat H-halo-padded rows
    M = Mp - 2                  # flat conv-output rows = N*H valid + 2*(N-1) batch-boundary junk

    # Lane-fold W into channels, pad H by 1 per batch (W halo lives in the weights), flatten rows.
    x_rows = jnp.pad(x.reshape(N, H, Lin), ((0, 0), (1, 1), (0, 0)))
    x_flat = x_rows.reshape(Mp, Lin).astype(MATMUL_DTYPE)              # (Mp, Lin) bf16

    w1 = _pack_toeplitz(params["w1"], W).astype(MATMUL_DTYPE)          # (3*Lin,  Lout)
    w2 = _pack_toeplitz(params["w2"], W).astype(MATMUL_DTYPE)          # (3*Lout, Lout)
    s_mat = jnp.tile(jnp.eye(Cout, dtype=jnp.float32), (W, 1))         # (Lout, Cout)
    g1 = params["g1"].reshape(1, Cout).astype(jnp.float32)
    be1 = params["be1"].reshape(1, Cout).astype(jnp.float32)
    g2 = params["g2"].reshape(1, Cout).astype(jnp.float32)
    be2 = params["be2"].reshape(1, Cout).astype(jnp.float32)
    # NOTE: conv biases b1/b2 intentionally not passed (cancelled by train-mode BN).

    # Valid-row mask over the flat conv-output rows: row r is real data iff (r mod (H+2)) < H.
    r = jnp.arange(M)
    mask = (jnp.mod(r, Hp) < H).astype(jnp.float32).reshape(M, 1)

    flops = (2 * M * (3 * Lin) * Lout            # conv1 GEMM
             + 2 * M * (3 * Lout) * Lout         # conv2 GEMM
             + 2 * 2 * (2 * M) * Lout * Cout)    # 2 stacked BN-stats GEMMs
    bytes_accessed = ((Mp * Lin + 3 * Lin * Lout + 3 * Lout * Lout) * 2   # bf16 inputs/weights
                      + (M * Lout + Lout * Cout + M + 4 * Cout) * 4)      # f32 out/selector/mask/BN

    vmem = pl.BlockSpec(memory_space=pltpu.MemorySpace.VMEM)
    kernel = functools.partial(_double_conv_bn_kernel, inv_cnt=1.0 / (N * H * W))
    out_rows = pl.pallas_call(
        kernel,
        out_shape=jax.ShapeDtypeStruct((M, Lout), jnp.float32),        # lane-dense output slab
        in_specs=[vmem] * 9,
        out_specs=vmem,
        cost_estimate=pl.CostEstimate(flops=flops, transcendentals=2 * Cout,
                                      bytes_accessed=bytes_accessed),
    )(x_flat, w1, g1, be1, w2, g2, be2, s_mat, mask)

    # Drop the 2*(N-1) junk batch-boundary rows and restore NCHW.
    out_full = jnp.pad(out_rows, ((0, 2), (0, 0))).reshape(N, Hp, W, Cout)[:, :H]
    return jnp.transpose(out_full, (0, 3, 1, 2))                        # NHWC -> NCHW


def _reference_forward(x_nchw, params):
    """Pure-JAX f32 reference (conv+bias -> train-mode BN -> LeakyReLU) x2, for validation."""
    def layer(x, w, b, gamma, beta):
        y = jax.lax.conv_general_dilated(
            x, w, window_strides=(1, 1), padding=((1, 1), (1, 1)),
            dimension_numbers=("NCHW", "OIHW", "NCHW"),
            precision=jax.lax.Precision.HIGHEST)
        y = y + b.reshape(1, -1, 1, 1)
        mean = jnp.mean(y, axis=(0, 2, 3), keepdims=True)
        var = jnp.mean((y - mean) ** 2, axis=(0, 2, 3), keepdims=True)
        y = (y - mean) * jax.lax.rsqrt(var + BN_EPS)
        y = y * gamma.reshape(1, -1, 1, 1) + beta.reshape(1, -1, 1, 1)
        return jnp.where(y > 0, y, LEAKY_SLOPE * y)

    h = layer(x_nchw, params["w1"], params["b1"], params["g1"], params["be1"])
    return layer(h, params["w2"], params["b2"], params["g2"], params["be2"])


if __name__ == "__main__":
    key = jax.random.PRNGKey(0)
    k_x, k_p = jax.random.split(key)

    batch, in_ch, out_ch, spatial = 2, 4, 8, 16
    x = jax.random.normal(k_x, (batch, in_ch, spatial, spatial), jnp.float32)
    params = init_params(k_p, in_ch, out_ch)

    out = jax.block_until_ready(double_conv_bn_forward(x, params))
    assert out.shape == (batch, out_ch, spatial, spatial), out.shape
    assert bool(jnp.all(jnp.isfinite(out)))

    ref = jax.block_until_ready(_reference_forward(x, params))
    max_err = float(jnp.max(jnp.abs(out - ref)))
    assert max_err < 1e-1, f"max abs err vs f32 reference: {max_err}"

    print("KERNEL_OK")
</pallas_src>

<mosaic_0001>
module attributes {stable_mosaic.version = 11 : i64} {
  func.func @_double_conv_bn_kernel(%arg0: memref<36x64xbf16, #tpu.memory_space<vmem>>, %arg1: memref<192x128xbf16, #tpu.memory_space<vmem>>, %arg2: memref<1x8xf32, #tpu.memory_space<vmem>>, %arg3: memref<1x8xf32, #tpu.memory_space<vmem>>, %arg4: memref<384x128xbf16, #tpu.memory_space<vmem>>, %arg5: memref<1x8xf32, #tpu.memory_space<vmem>>, %arg6: memref<1x8xf32, #tpu.memory_space<vmem>>, %arg7: memref<128x8xf32, #tpu.memory_space<vmem>>, %arg8: memref<34x1xf32, #tpu.memory_space<vmem>>, %arg9: memref<34x128xf32, #tpu.memory_space<vmem>>) attributes {dimension_semantics = [], scalar_prefetch = 0 : i64, scratch_operands = 0 : i64, tpu.core_type = #tpu.core_type<tc>} {
    %c0 = arith.constant 0 : index
    %c0_0 = arith.constant 0 : index
    %0 = vector.load %arg8[%c0, %c0_0] : memref<34x1xf32, #tpu.memory_space<vmem>>, vector<34x1xf32>
    %1 = vector.shape_cast %0 : vector<34x1xf32> to vector<34x1xf32>
    %2 = vector.broadcast %1 : vector<34x1xf32> to vector<34x128xf32>
    %c0_1 = arith.constant 0 : index
    %c0_2 = arith.constant 0 : index
    %3 = vector.load %arg0[%c0_1, %c0_2] : memref<36x64xbf16, #tpu.memory_space<vmem>>, vector<36x64xbf16>
    %4 = vector.extract_strided_slice %3 {offsets = [0, 0], sizes = [34, 64], strides = [1, 1]} : vector<36x64xbf16> to vector<34x64xbf16>
    %5 = vector.extract_strided_slice %3 {offsets = [1, 0], sizes = [34, 64], strides = [1, 1]} : vector<36x64xbf16> to vector<34x64xbf16>
    %6 = vector.extract_strided_slice %3 {offsets = [2, 0], sizes = [34, 64], strides = [1, 1]} : vector<36x64xbf16> to vector<34x64xbf16>
    %7 = tpu.concatenate %4, %5, %6 in 1 : vector<34x64xbf16>, vector<34x64xbf16>, vector<34x64xbf16> -> vector<34x192xbf16>
    %c0_3 = arith.constant 0 : index
    %c0_4 = arith.constant 0 : index
    %8 = vector.load %arg1[%c0_3, %c0_4] : memref<192x128xbf16, #tpu.memory_space<vmem>>, vector<192x128xbf16>
    %cst = arith.constant dense<0.000000e+00> : vector<34x128xf32>
    %9 = tpu.matmul %7, %8, %cst {dimension_numbers = #tpu.dot_dimension_numbers<[1], [0], [0], [1], [0, 0, 1, 1], [], []>} : vector<34x192xbf16>, vector<192x128xbf16>, vector<34x128xf32> -> vector<34x128xf32>
    %10 = arith.mulf %9, %2 : vector<34x128xf32>
    %11 = arith.mulf %10, %9 : vector<34x128xf32>
    %12 = tpu.concatenate %10, %11 in 0 : vector<34x128xf32>, vector<34x128xf32> -> vector<68x128xf32>
    %c0_5 = arith.constant 0 : index
    %c0_6 = arith.constant 0 : index
    %13 = vector.load %arg7[%c0_5, %c0_6] : memref<128x8xf32, #tpu.memory_space<vmem>>, vector<128x8xf32>
    %cst_7 = arith.constant dense<0.000000e+00> : vector<68x8xf32>
    %14 = tpu.matmul %12, %13, %cst_7 {dimension_numbers = #tpu.dot_dimension_numbers<[1], [0], [0], [1], [0, 0, 1, 1], [], []>} : vector<68x128xf32>, vector<128x8xf32>, vector<68x8xf32> -> vector<68x8xf32>
    %15 = vector.extract_strided_slice %14 {offsets = [0, 0], sizes = [34, 8], strides = [1, 1]} : vector<68x8xf32> to vector<34x8xf32>
    %cst_8 = arith.constant dense<0.000000e+00> : vector<8xf32>
    %16 = vector.multi_reduction <add>, %15, %cst_8 [0] : vector<34x8xf32> to vector<8xf32>
    %17 = vector.shape_cast %16 : vector<8xf32> to vector<1x8xf32>
    %cst_9 = arith.constant 0.001953125 : f32
    %18 = vector.broadcast %cst_9 : f32 to vector<1x8xf32>
    %19 = arith.mulf %17, %18 : vector<1x8xf32>
    %20 = vector.extract_strided_slice %14 {offsets = [34, 0], sizes = [34, 8], strides = [1, 1]} : vector<68x8xf32> to vector<34x8xf32>
    %cst_10 = arith.constant dense<0.000000e+00> : vector<8xf32>
    %21 = vector.multi_reduction <add>, %20, %cst_10 [0] : vector<34x8xf32> to vector<8xf32>
    %22 = vector.shape_cast %21 : vector<8xf32> to vector<1x8xf32>
    %cst_11 = arith.constant 0.001953125 : f32
    %23 = vector.broadcast %cst_11 : f32 to vector<1x8xf32>
    %24 = arith.mulf %22, %23 : vector<1x8xf32>
    %25 = arith.mulf %19, %19 : vector<1x8xf32>
    %26 = arith.subf %24, %25 : vector<1x8xf32>
    %cst_12 = arith.constant 0.000000e+00 : f32
    %27 = vector.broadcast %cst_12 : f32 to vector<1x8xf32>
    %28 = arith.maximumf %26, %27 : vector<1x8xf32>
    %c0_13 = arith.constant 0 : index
    %c0_14 = arith.constant 0 : index
    %29 = vector.load %arg2[%c0_13, %c0_14] : memref<1x8xf32, #tpu.memory_space<vmem>>, vector<1x8xf32>
    %cst_15 = arith.constant 9.99999974E-6 : f32
    %30 = vector.broadcast %cst_15 : f32 to vector<1x8xf32>
    %31 = arith.addf %28, %30 : vector<1x8xf32>
    %32 = math.rsqrt %31 : vector<1x8xf32>
    %33 = arith.mulf %29, %32 : vector<1x8xf32>
    %c0_16 = arith.constant 0 : index
    %c0_17 = arith.constant 0 : index
    %34 = vector.load %arg3[%c0_16, %c0_17] : memref<1x8xf32, #tpu.memory_space<vmem>>, vector<1x8xf32>
    %35 = arith.mulf %19, %33 : vector<1x8xf32>
    %36 = arith.subf %34, %35 : vector<1x8xf32>
    %37 = tpu.concatenate %33, %36 in 0 : vector<1x8xf32>, vector<1x8xf32> -> vector<2x8xf32>
    %38 = tpu.concatenate %37, %37, %37, %37, %37, %37, %37, %37, %37, %37, %37, %37, %37, %37, %37, %37 in 1 : vector<2x8xf32>, vector<2x8xf32>, vector<2x8xf32>, vector<2x8xf32>, vector<2x8xf32>, vector<2x8xf32>, vector<2x8xf32>, vector<2x8xf32>, vector<2x8xf32>, vector<2x8xf32>, vector<2x8xf32>, vector<2x8xf32>, vector<2x8xf32>, vector<2x8xf32>, vector<2x8xf32>, vector<2x8xf32> -> vector<2x128xf32>
    %39 = vector.extract_strided_slice %38 {offsets = [0, 0], sizes = [1, 128], strides = [1, 1]} : vector<2x128xf32> to vector<1x128xf32>
    %40 = vector.broadcast %39 : vector<1x128xf32> to vector<34x128xf32>
    %41 = arith.mulf %9, %40 : vector<34x128xf32>
    %42 = vector.extract_strided_slice %38 {offsets = [1, 0], sizes = [1, 128], strides = [1, 1]} : vector<2x128xf32> to vector<1x128xf32>
    %43 = vector.broadcast %42 : vector<1x128xf32> to vector<34x128xf32>
    %44 = arith.addf %41, %43 : vector<34x128xf32>
    %cst_18 = arith.constant 0.00999999977 : f32
    %45 = vector.broadcast %cst_18 : f32 to vector<34x128xf32>
    %46 = arith.mulf %45, %44 : vector<34x128xf32>
    %47 = arith.maximumf %44, %46 : vector<34x128xf32>
    %48 = arith.mulf %47, %2 : vector<34x128xf32>
    %cst_19 = arith.constant 0.000000e+00 : bf16
    %49 = vector.broadcast %cst_19 : bf16 to vector<1x128xbf16>
    %50 = arith.truncf %48 : vector<34x128xf32> to vector<34x128xbf16>
    %51 = tpu.concatenate %49, %50, %49 in 0 : vector<1x128xbf16>, vector<34x128xbf16>, vector<1x128xbf16> -> vector<36x128xbf16>
    %52 = vector.extract_strided_slice %51 {offsets = [0, 0], sizes = [34, 128], strides = [1, 1]} : vector<36x128xbf16> to vector<34x128xbf16>
    %53 = vector.extract_strided_slice %51 {offsets = [1, 0], sizes = [34, 128], strides = [1, 1]} : vector<36x128xbf16> to vector<34x128xbf16>
    %54 = vector.extract_strided_slice %51 {offsets = [2, 0], sizes = [34, 128], strides = [1, 1]} : vector<36x128xbf16> to vector<34x128xbf16>
    %55 = tpu.concatenate %52, %53, %54 in 1 : vector<34x128xbf16>, vector<34x128xbf16>, vector<34x128xbf16> -> vector<34x384xbf16>
    %c0_20 = arith.constant 0 : index
    %c0_21 = arith.constant 0 : index
    %56 = vector.load %arg4[%c0_20, %c0_21] : memref<384x128xbf16, #tpu.memory_space<vmem>>, vector<384x128xbf16>
    %cst_22 = arith.constant dense<0.000000e+00> : vector<34x128xf32>
    %57 = tpu.matmul %55, %56, %cst_22 {dimension_numbers = #tpu.dot_dimension_numbers<[1], [0], [0], [1], [0, 0, 1, 1], [], []>} : vector<34x384xbf16>, vector<384x128xbf16>, vector<34x128xf32> -> vector<34x128xf32>
    %58 = arith.mulf %57, %2 : vector<34x128xf32>
    %59 = arith.mulf %58, %57 : vector<34x128xf32>
    %60 = tpu.concatenate %58, %59 in 0 : vector<34x128xf32>, vector<34x128xf32> -> vector<68x128xf32>
    %c0_23 = arith.constant 0 : index
    %c0_24 = arith.constant 0 : index
    %61 = vector.load %arg7[%c0_23, %c0_24] : memref<128x8xf32, #tpu.memory_space<vmem>>, vector<128x8xf32>
    %cst_25 = arith.constant dense<0.000000e+00> : vector<68x8xf32>
    %62 = tpu.matmul %60, %61, %cst_25 {dimension_numbers = #tpu.dot_dimension_numbers<[1], [0], [0], [1], [0, 0, 1, 1], [], []>} : vector<68x128xf32>, vector<128x8xf32>, vector<68x8xf32> -> vector<68x8xf32>
    %63 = vector.extract_strided_slice %62 {offsets = [0, 0], sizes = [34, 8], strides = [1, 1]} : vector<68x8xf32> to vector<34x8xf32>
    %cst_26 = arith.constant dense<0.000000e+00> : vector<8xf32>
    %64 = vector.multi_reduction <add>, %63, %cst_26 [0] : vector<34x8xf32> to vector<8xf32>
    %65 = vector.shape_cast %64 : vector<8xf32> to vector<1x8xf32>
    %cst_27 = arith.constant 0.001953125 : f32
    %66 = vector.broadcast %cst_27 : f32 to vector<1x8xf32>
    %67 = arith.mulf %65, %66 : vector<1x8xf32>
    %68 = vector.extract_strided_slice %62 {offsets = [34, 0], sizes = [34, 8], strides = [1, 1]} : vector<68x8xf32> to vector<34x8xf32>
    %cst_28 = arith.constant dense<0.000000e+00> : vector<8xf32>
    %69 = vector.multi_reduction <add>, %68, %cst_28 [0] : vector<34x8xf32> to vector<8xf32>
    %70 = vector.shape_cast %69 : vector<8xf32> to vector<1x8xf32>
    %cst_29 = arith.constant 0.001953125 : f32
    %71 = vector.broadcast %cst_29 : f32 to vector<1x8xf32>
    %72 = arith.mulf %70, %71 : vector<1x8xf32>
    %73 = arith.mulf %67, %67 : vector<1x8xf32>
    %74 = arith.subf %72, %73 : vector<1x8xf32>
    %cst_30 = arith.constant 0.000000e+00 : f32
    %75 = vector.broadcast %cst_30 : f32 to vector<1x8xf32>
    %76 = arith.maximumf %74, %75 : vector<1x8xf32>
    %c0_31 = arith.constant 0 : index
    %c0_32 = arith.constant 0 : index
    %77 = vector.load %arg5[%c0_31, %c0_32] : memref<1x8xf32, #tpu.memory_space<vmem>>, vector<1x8xf32>
    %cst_33 = arith.constant 9.99999974E-6 : f32
    %78 = vector.broadcast %cst_33 : f32 to vector<1x8xf32>
    %79 = arith.addf %76, %78 : vector<1x8xf32>
    %80 = math.rsqrt %79 : vector<1x8xf32>
    %81 = arith.mulf %77, %80 : vector<1x8xf32>
    %c0_34 = arith.constant 0 : index
    %c0_35 = arith.constant 0 : index
    %82 = vector.load %arg6[%c0_34, %c0_35] : memref<1x8xf32, #tpu.memory_space<vmem>>, vector<1x8xf32>
    %83 = arith.mulf %67, %81 : vector<1x8xf32>
    %84 = arith.subf %82, %83 : vector<1x8xf32>
    %85 = tpu.concatenate %81, %84 in 0 : vector<1x8xf32>, vector<1x8xf32> -> vector<2x8xf32>
    %86 = tpu.concatenate %85, %85, %85, %85, %85, %85, %85, %85, %85, %85, %85, %85, %85, %85, %85, %85 in 1 : vector<2x8xf32>, vector<2x8xf32>, vector<2x8xf32>, vector<2x8xf32>, vector<2x8xf32>, vector<2x8xf32>, vector<2x8xf32>, vector<2x8xf32>, vector<2x8xf32>, vector<2x8xf32>, vector<2x8xf32>, vector<2x8xf32>, vector<2x8xf32>, vector<2x8xf32>, vector<2x8xf32>, vector<2x8xf32> -> vector<2x128xf32>
    %87 = vector.extract_strided_slice %86 {offsets = [0, 0], sizes = [1, 128], strides = [1, 1]} : vector<2x128xf32> to vector<1x128xf32>
    %88 = vector.broadcast %87 : vector<1x128xf32> to vector<34x128xf32>
    %89 = arith.mulf %57, %88 : vector<34x128xf32>
    %90 = vector.extract_strided_slice %86 {offsets = [1, 0], sizes = [1, 128], strides = [1, 1]} : vector<2x128xf32> to vector<1x128xf32>
    %91 = vector.broadcast %90 : vector<1x128xf32> to vector<34x128xf32>
    %92 = arith.addf %89, %91 : vector<34x128xf32>
    %cst_36 = arith.constant 0.00999999977 : f32
    %93 = vector.broadcast %cst_36 : f32 to vector<34x128xf32>
    %94 = arith.mulf %93, %92 : vector<34x128xf32>
    %95 = arith.maximumf %92, %94 : vector<34x128xf32>
    %96 = arith.mulf %95, %2 : vector<34x128xf32>
    %c0_37 = arith.constant 0 : index
    %c0_38 = arith.constant 0 : index
    %97 = vector.load %arg9[%c0_37, %c0_38] : memref<34x128xf32, #tpu.memory_space<vmem>>, vector<34x128xf32>
    tpu.vector_store %arg9[%c0_37, %c0_38], %96 {strides = array<i32>} : memref<34x128xf32, #tpu.memory_space<vmem>>, vector<34x128xf32>,
    return
  }
}

</mosaic_0001>

<bundles_post_ra>
// kernel: double_conv_bn_forward.1
= control target key start
LH: loop header
LB: loop body
LE: loop exit
PB: predicated region body
PF: predicated region fallthrough
CT: control target
= control target key end

     0   :  { %v1723_v0 = vmov 0   ;;  %vm81_vm0 = vsmask.f32 7424  ;;  %vm111_vm1 = vcmask 1046528   ;;  %vm2397_vm2 = vcmask 523264   ;;  %s1724_s20 = smov 64   ;;  %s2383_s0 = inlined_call_operand.vmem [shape: bf16[36,64], index: 0, kind: input, shape index: {}]   ;;  %s2384_s1 = inlined_call_operand.vmem [shape: bf16[192,128], index: 1, kind: input, shape index: {}]   ;;  %s2385_s8 = inlined_call_operand.vmem [shape: f32[34,1], index: 8, kind: input, shape index: {}]   ;;  %s2386_s7 = inlined_call_operand.vmem [shape: f32[128,8], index: 7, kind: input, shape index: {}]   ;;  %s2387_s2 = inlined_call_operand.vmem [shape: f32[1,8], index: 2, kind: input, shape index: {}]   ;;  %s2388_s3 = inlined_call_operand.vmem [shape: f32[1,8], index: 3, kind: input, shape index: {}]   ;;  %s2389_s4 = inlined_call_operand.vmem [shape: bf16[384,128], index: 4, kind: input, shape index: {}]   ;;  %s2390_s5 = inlined_call_operand.vmem [shape: f32[1,8], index: 5, kind: input, shape index: {}]   ;;  %s2391_s6 = inlined_call_operand.vmem [shape: f32[1,8], index: 6, kind: input, shape index: {}]   ;;  %s2392_s9 = inlined_call_operand.vmem [shape: f32[34,128], index: 9, kind: output, shape index: {}]  }
   0x1   :  { %232 = vmatprep.subr.bf16.mxu0 %v1723_v0  ;;  %1678 = vset.pattern.permute.xlu1 %v1723_v0  ;;  %v1797_v1 = vld [vmem:[%s2383_s0] sm:$0xff]   ;;  %v1802_v2 = vld [vmem:[%s2383_s0 + $0x8] sm:$0xff]   ;;  %v1808_v3 = vld [vmem:[%s2383_s0 + $0x10] ss:$0 sps:$4 sm:$0x33]   ;;  %v1725_v25 = vmov 0.0|0.0  }
   0x2   :  { %1679 = vset.pattern.permute.xlu0 %v1723_v0  ;;  %v1683_v4 = vld [vmem:[%s2384_s1] sm:$0xff]   ;;  %v83_v5 = vshrl.u32 %v1797_v1, 16  ;;  %v85_v6 = vshll.u32 %v1797_v1, 16  ;;  %v90_v7 = vshll.u32 %v1802_v2, 16  ;;  %v94_v8 = vshrl.u32 %v1802_v2, 16  ;;  %v1684_v13 = vld [vmem:[%s2384_s1 + $0x8] sm:$0xff]   ;;  %1595 = vmatprep.subr.bf16.mxu1 %v1725_v25 }
   0x3   :  { %v98_v9 = vshll.u32 %v1808_v3, 16  ;;  %v102_v10 = vshrl.u32 %v1808_v3, 16  ;;  %233 = vmatpush1.bf16.msra.mxu0 %v1683_v4  ;;  %v1685_v18 = vld [vmem:[%s2384_s1 + $0x10] sm:$0xff]   ;;  %v112_v19 = vrot.slane %v1797_v1, 1  ;;  %v113_v21 = vrot.slane %v1802_v2, 1  ;;  %v1686_v24 = vld [vmem:[%s2384_s1 + $0x18] sm:$0xff]  }
   0x4   :  { %v87_v11 = vrot.slane %v85_v6, 1  ;;  %v92_v12 = vrot.slane %v90_v7, 1  ;;  %234 = vmatprep.subr.bf16.mxu0 %v1723_v0  ;;  %v1687_v26 = vld [vmem:[%s2384_s1 + $0x20] sm:$0xff]   ;;  %v34_v28 = vld [vmem:[%s2385_s8 + $0x8] sm:$0xff]  ;;  %v35_v30 = vld [vmem:[%s2385_s8 + $0x10] sm:$0xff]  ;;  %v115_v60 = vrot.slane %v1808_v3, 1 }
   0x5   :  { %v100_v14 = vrot.slane %v98_v9, 1  ;;  %v114_v23 = vsel %vm111_vm1, %v112_v19, %v113_v21  ;;  %v33_v27 = vld [vmem:[%s2385_s8] sm:$0xff]  ;;  %v320_v31 = vld [vmem:[%s2386_s7 + $0x8] sm:$0xff]  ;;  %v321_v34 = vld [vmem:[%s2386_s7 + $0x10] sm:$0xff]  ;;  %vm1726_vm3 = vmmov 0   ;;  %vm303_vm4 = vcmask 1041408  }
   0x6   :  { %v88_v15 = vor.u32 %v87_v11, %v83_v5  ;;  %v96_v16 = vor.u32 %v94_v8, %v92_v12  ;;  %1327 = vmatprep.mubr.msk.bf16.mxu0 %vm2397_vm2, %v114_v23  ;;  %v319_v29 = vld [vmem:[%s2386_s7] sm:$0xff]  ;;  %v322_v35 = vld [vmem:[%s2386_s7 + $0x18] sm:$0xff]  ;;  %v1688_v36 = vld [vmem:[%s2384_s1 + $0x28] sm:$0xff]   ;;  %v116_v62 = vsel %vm111_vm1, %v113_v21, %v115_v60  ;;  %vm445_vm5 = vcmask 64512   ;;  %s1729_s17 = smov 8   ;;  %s1731_s18 = smov 24  }
   0x7   :  { %v104_v17 = vor.u32 %v102_v10, %v100_v14  ;;  %235 = vmatpush1.bf16.msra.mxu0 %v1684_v13  ;;  %v37_v32 = vld [vmem:[%s2385_s8 + $0x20] sm:$0x3]  ;;  %v1865_v33 = vpack.c.bf16 %v320_v31, %v319_v29  ;;  %v36_v37 = vld [vmem:[%s2385_s8 + $0x18] sm:$0xff]  ;;  %v1881_v38 = vpack.c.bf16 %v322_v35, %v321_v34  ;;  %v324_v40 = vld [vmem:[%s2386_s7 + $0x28] sm:$0xff]  ;;  %vm453_vm6 = vcmask 58368   ;;  %s1732_s22 = smov 48  }
   0x8   :  { %v93_v20 = vsel %vm81_vm0, %v88_v15, %v92_v12  ;;  %236 = vmatprep.subr.bf16.mxu0 %v1723_v0  ;;  %v101_v22 = vsel %vm81_vm0, %v96_v16, %v100_v14  ;;  %v323_v39 = vld [vmem:[%s2386_s7 + $0x20] sm:$0xff]  ;;  %v1689_v41 = vld [vmem:[%s2384_s1 + $0x30] sm:$0xff]   ;;  %v326_v44 = vld [vmem:[%s2386_s7 + $0x38] sm:$0xff]  ;;  %vm468_vm7 = vcmask 1045504   ;;  %vm515_vm8 = vcmask 1040384   ;;  %s1733_s23 = smov 40  }
   0x9   :  { %105 = vrot.lane.b32.xlu0 %v93_v20, %s1724_s20  ;;  %109 = vrot.lane.b32.xlu1 %v104_v17, %s1724_s20  ;;  %v1895_v42 = vpack.c.bf16 %v324_v40, %v323_v39  ;;  %v325_v43 = vld [vmem:[%s2386_s7 + $0x30] sm:$0xff]  ;;  %v1690_v45 = vld [vmem:[%s2384_s1 + $0x38] sm:$0xff]   ;;  %s1734_s8 = smov 56   ;;  %s1735_s12 = smov 80   ;;  %vm564_vm9 = vcmask 130048   ;;  %vm2393_vm10 = vcmask 195584  }
   0xa   :  { %1597 = vmatpush3.bf16.msra.mxu1 %v1865_v33  ;;  %v1909_v46 = vpack.c.bf16 %v326_v44, %v325_v43  ;;  %v327_v47 = vld [vmem:[%s2386_s7 + $0x40] sm:$0xff]  ;;  %v328_v48 = vld [vmem:[%s2386_s7 + $0x48] sm:$0xff]  ;;  %v329_v51 = vld [vmem:[%s2386_s7 + $0x50] sm:$0xff]  ;;  %s1736_s13 = smov 72   ;;  %s1737_s15 = smov 96   ;;  %vm2394_vm11 = vcmask 261120  }
   0xb   :  { %237 = vmatpush1.bf16.msra.mxu0 %v1685_v18  ;;  %1598 = vmatprep.subr.bf16.mxu1 %v1725_v25  ;;  %v1691_v49 = vld [vmem:[%s2384_s1 + $0x40] sm:$0xff]   ;;  %v1923_v50 = vpack.c.bf16 %v328_v48, %v327_v47  ;;  %v330_v52 = vld [vmem:[%s2386_s7 + $0x58] sm:$0xff]  ;;  %v1692_v53 = vld [vmem:[%s2384_s1 + $0x48] sm:$0xff]   ;;  %s1738_s16 = smov 88   ;;  %s1739_s27 = smov 112   ;;  %vm2395_vm12 = vcmask 326656  }
   0xc   :  { %238 = vmatprep.subr.bf16.mxu0 %v1723_v0  ;;  %v1937_v54 = vpack.c.bf16 %v330_v52, %v329_v51  ;;  %v331_v55 = vld [vmem:[%s2386_s7 + $0x60] sm:$0xff]  ;;  %v332_v56 = vld [vmem:[%s2386_s7 + $0x68] sm:$0xff]  ;;  %v1693_v57 = vld [vmem:[%s2384_s1 + $0x50] sm:$0xff]   ;;  %s1740_s28 = smov 104   ;;  %vm2396_vm13 = vcmask 392192   ;;  %vm2398_vm14 = vcmask 457728  }
   0xd   :  { %107 = vrot.lane.b32.xlu0 %v101_v22, %s1724_s20  ;;  %40 = vperm.xlu1 %1678, %v33_v27   ;;  %v1951_v58 = vpack.c.bf16 %v332_v56, %v331_v55  ;;  %v1694_v59 = vld [vmem:[%s2384_s1 + $0x58] sm:$0xff]   ;;  %v333_v7 = vld [vmem:[%s2386_s7 + $0x70] sm:$0xff]  ;;  %vm577_vm15 = vcmask 588800  }
   0xe   :  { %1600 = vmatpush3.bf16.msra.mxu1 %v1881_v38 }
   0xf   :  { %239 = vmatpush1.bf16.msra.mxu0 %v1686_v24  ;;  %1601 = vmatprep.subr.bf16.mxu1 %v1725_v25 }
  0x10   :  { %240 = vmatprep.subr.bf16.mxu0 %v1723_v0 }
  0x11   :  { %45 = vperm.xlu0 %1679, %v34_v28   ;;  %50 = vperm.xlu1 %1678, %v35_v30  }
  0x12   :  { %1603 = vmatpush3.bf16.msra.mxu1 %v1895_v42 }
  0x13   :  { %241 = vmatpush1.bf16.msra.mxu0 %v1687_v26  ;;  %1604 = vmatprep.subr.bf16.mxu1 %v1725_v25 }
  0x14   :  { %242 = vmatprep.subr.bf16.mxu0 %v1723_v0 }
  0x15   :  { %60 = vperm.xlu0 %1679, %v37_v32   ;;  %55 = vperm.xlu1 %1678, %v36_v37  }
  0x16   :  { %1606 = vmatpush3.bf16.msra.mxu1 %v1909_v46 }
  0x17   :  { %243 = vmatpush1.bf16.msra.mxu0 %v1688_v36  ;;  %1607 = vmatprep.subr.bf16.mxu1 %v1725_v25 }
  0x18   :  { %244 = vmatprep.subr.bf16.mxu0 %v1723_v0 }
  0x1a   :  { %1609 = vmatpush3.bf16.msra.mxu1 %v1923_v50 }
  0x1b   :  { %245 = vmatpush1.bf16.msra.mxu0 %v1689_v41  ;;  %1610 = vmatprep.subr.bf16.mxu1 %v1725_v25 }
  0x1c   :  { %246 = vmatprep.subr.bf16.mxu0 %v1723_v0 }
  0x1e   :  { %1612 = vmatpush3.bf16.msra.mxu1 %v1937_v54 }
  0x1f   :  { %247 = vmatpush1.bf16.msra.mxu0 %v1690_v45  ;;  %1613 = vmatprep.subr.bf16.mxu1 %v1725_v25 }
  0x20   :  { %248 = vmatprep.subr.bf16.mxu0 %v1723_v0 }
  0x22   :  { %1615 = vmatpush3.bf16.msra.mxu1 %v1951_v58 }
  0x23   :  { %249 = vmatpush1.bf16.msra.mxu0 %v1691_v49  ;;  %1616 = vmatprep.subr.bf16.mxu1 %v1725_v25 }
  0x24   :  { %250 = vmatprep.subr.bf16.mxu0 %v1723_v0 }
  0x27   :  { %251 = vmatpush1.bf16.msra.mxu0 %v1692_v53 }
  0x28   :  { %252 = vmatprep.subr.bf16.mxu0 %v1723_v0 }
  0x2b   :  { %253 = vmatpush1.bf16.msra.mxu0 %v1693_v57 }
  0x2c   :  { %254 = vmatprep.subr.bf16.mxu0 %v1723_v0 }
  0x2f   :  { %255 = vmatpush1.bf16.msra.mxu0 %v1694_v59 }
  0x7b   :  { %v106_v61 = vpop.permute.xlu0 %105  ;;  %v110_v5 = vpop.permute.xlu1 %109 }
  0x7c   :  { %v119_v63 = vsel %vm2397_vm2, %v1797_v1, %v106_v61  ;;  %v125_v6 = vsel %vm2397_vm2, %v1808_v3, %v110_v5  ;;  %v334_v1 = vld [vmem:[%s2386_s7 + $0x78] sm:$0xff]  ;;  %s1741_s7 = smov 120  }
  0x7d   :  { %265 = vmatmul.mubr.bf16.vlgmr.msra.gmra.mrb[0].mxu0 %v119_v63  ;;  %v1978_v8 = vpack.c.bf16 %v334_v1, %v333_v7 }
  0x7e   :  { %1328 = vmatprep.mubr.msk.bf16.mxu0 %vm2397_vm2, %v116_v62 }
  0x7f   :  { %v108_v4 = vpop.permute.xlu0 %107  ;;  %1618 = vmatpush3.bf16.msra.mxu1 %v1978_v8 }
  0x80   :  { %v122_v0 = vsel %vm2397_vm2, %v1802_v2, %v108_v4  ;;  %v1727_v2 = vmov 0.0  }
  0x81   :  { %1481 = vmatprep.mubr.msk.f32.mxu1 %vm1726_vm3, %v1727_v2  ;;  %1508 = vmatprep.subr.bf16.mxu0 %v1727_v2 }
  0x85   :  { %273 = vmatmul.mubr.bf16.gmra.mrb[4].mxu0 %v122_v0 }
  0x86   :  { %1329 = vmatprep.mubr.msk.bf16.mxu0 %vm2397_vm2, %v115_v60 }
  0x8c   :  { %v1986_v3 = vpop.permute.xlu1 %40 }
  0x8d   :  { %281 = vmatmul.mubr.bf16.gmra.mrb[8].mxu0 %v125_v6 }
  0x8e   :  { %1524 = vmatprep.mubr.msk.bf16.mxu0 %vm1726_vm3, %v1727_v2 }
  0x90   :  { %v1990_v10 = vpop.permute.xlu0 %45  ;;  %v1999_v17 = vpop.permute.xlu1 %50 }
  0x94   :  { %v2011_v26 = vpop.permute.xlu1 %55  ;;  %v2022_v36 = vpop.permute.xlu0 %60 }
 0x150   :  { %v1988_v9 = vpop.f32.mrb[0].mxu0 }
 0x151   :  { %v288_v11 = vmul.f32 %v1988_v9, %v1986_v3  ;;  %v268_v12 = vpop.f32.mrb[1].mxu0 }
 0x152   :  { %v1994_v13 = vpop.f32.mrb[2].mxu0 }
 0x153   :  { %v293_v14 = vmul.f32 %v288_v11, %v1988_v9  ;;  %v289_v15 = vmul.f32 %v1994_v13, %v1990_v10  ;;  %v271_v16 = vpop.f32.mrb[3].mxu0  ;;  %1482 = vmatmul.mubr.f32.vlgmr.msra.gmra.mrb[0].mxu1 %v288_v11 }
 0x154   :  { %1484 = vmatprep.mubr.msk.f32.mxu1 %vm1726_vm3, %v1727_v2 }
 0x155   :  { %v294_v18 = vmul.f32 %v289_v15, %v1994_v13  ;;  %v304_v19 = vrot.slane %v293_v14, 6 }
 0x157   :  { %v305_v20 = vrot.slane %v294_v18, 6  ;;  %1485 = vmatmul.mubr.f32.gmra.mrb[2].mxu1 %v289_v15 }
 0x158   :  { %v2004_v21 = vpop.f32.mrb[4].mxu0  ;;  %1487 = vmatprep.mubr.msk.f32.mxu1 %vm1726_vm3, %v1727_v2 }
 0x159   :  { %v290_v22 = vmul.f32 %v2004_v21, %v1999_v17  ;;  %v276_v23 = vpop.f32.mrb[5].mxu0  ;;  %v306_v24 = vsel %vm303_vm4, %v304_v19, %v305_v20 }
 0x15a   :  { %v2013_v27 = vpop.f32.mrb[6].mxu0 }
 0x15b   :  { %v295_v28 = vmul.f32 %v290_v22, %v2004_v21  ;;  %v291_v29 = vmul.f32 %v2013_v27, %v2011_v26  ;;  %v279_v30 = vpop.f32.mrb[7].mxu0  ;;  %1488 = vmatmul.mubr.f32.gmra.mrb[4].mxu1 %v290_v22 }
 0x15c   :  { %1490 = vmatprep.mubr.msk.f32.mxu1 %vm1726_vm3, %v1727_v2 }
 0x15d   :  { %v307_v31 = vrot.slane %v295_v28, 6  ;;  %v296_v32 = vmul.f32 %v291_v29, %v2013_v27 }
 0x15f   :  { %v309_v34 = vrot.slane %v296_v32, 6  ;;  %1491 = vmatmul.mubr.f32.gmra.mrb[6].mxu1 %v291_v29  ;;  %v308_v35 = vsel %vm303_vm4, %v305_v20, %v307_v31 }
 0x160   :  { %v2024_v37 = vpop.f32.mrb[8].mxu0  ;;  %1493 = vmatprep.mubr.msk.f32.mxu1 %vm1726_vm3, %v1727_v2 }
 0x161   :  { %v292_v39 = vmul.f32 %v2024_v37, %v2022_v36  ;;  %v284_v40 = vpop.f32.mrb[9].mxu0  ;;  %v310_v41 = vsel %vm303_vm4, %v307_v31, %v309_v34 }
 0x162   :  { %v285_v43 = vpop.f32.mrb[10].mxu0 }
 0x163   :  { %v297_v44 = vmul.f32 %v292_v39, %v2024_v37  ;;  %v286_v45 = vpop.f32.mrb[11].mxu0  ;;  %v318_v47 = vsel %vm303_vm4, %v292_v39, %v304_v19 }
 0x164   :  { %1494 = vmatmul.mubr.f32.gmra.mrb[8].mxu1 %v318_v47 }
 0x165   :  { %v311_v48 = vrot.slane %v297_v44, 6  ;;  %1496 = vmatprep.mubr.msk.f32.mxu1 %vm1726_vm3, %v1727_v2 }
 0x167   :  { %v312_v49 = vsel %vm303_vm4, %v309_v34, %v311_v48 }
 0x168   :  { %1497 = vmatmul.mubr.f32.gmra.mrb[10].mxu1 %v306_v24 }
 0x169   :  { %1499 = vmatprep.mubr.msk.f32.mxu1 %vm1726_vm3, %v1727_v2 }
 0x16c   :  { %1500 = vmatmul.mubr.f32.gmra.mrb[12].mxu1 %v308_v35 }
 0x16d   :  { %1502 = vmatprep.mubr.msk.f32.mxu1 %vm1726_vm3, %v1727_v2 }
 0x170   :  { %1503 = vmatmul.mubr.f32.gmra.mrb[14].mxu1 %v310_v41 }
 0x171   :  { %1505 = vmatprep.mubr.msk.f32.mxu1 %vm1726_vm3, %v1727_v2 }
 0x174   :  { %1506 = vmatmul.mubr.f32.gmra.mrb[16].mxu1 %v312_v49 }
 0x226   :  { %v401_v51 = vpop.f32.mrb[0].mxu1 }
 0x227   :  { %v1483_v52 = vpop.f32.mrb[1].mxu1  ;;  %v446_v55 = vsel %vm445_vm5, %v401_v51, 0.0 }
 0x22a   :  { %v406_v53 = vpop.f32.mrb[2].mxu1 }
 0x22b   :  { %v447_v56 = vsel %vm445_vm5, %v406_v53, 0.0  ;;  %v1486_v57 = vpop.f32.mrb[3].mxu1 }
 0x22c   :  { %v448_v59 = vadd.f32 %v447_v56, %v446_v55 }
 0x22e   :  { %v411_v60 = vpop.f32.mrb[4].mxu1 }
 0x22f   :  { %v449_v61 = vsel %vm445_vm5, %v411_v60, 0.0  ;;  %v1489_v62 = vpop.f32.mrb[5].mxu1 }
 0x230   :  { %v450_v63 = vadd.f32 %v449_v61, %v448_v59 }
 0x232   :  { %v416_v4 = vpop.f32.mrb[6].mxu1 }
 0x233   :  { %v451_v0 = vsel %vm445_vm5, %v416_v4, 0.0  ;;  %v1492_v5 = vpop.f32.mrb[7].mxu1 }
 0x234   :  { %v452_v6 = vadd.f32 %v451_v0, %v450_v63 }
 0x237   :  { %v421_v7 = vpop.f32.mrb[8].mxu1 }
 0x238   :  { %v454_v1 = vsel %vm453_vm6, %v421_v7, 0.0  ;;  %v1495_v11 = vpop.f32.mrb[9].mxu1  ;;  %v469_v15 = vrot.slane %v421_v7, 2 }
 0x239   :  { %v455_v12 = vadd.f32 %v454_v1, %v452_v6 }
 0x23b   :  { %v426_v14 = vpop.f32.mrb[10].mxu1  ;;  %v456_v22 = vrot.slane %v455_v12, 4 }
 0x23c   :  { %v470_v16 = vrot.slane %v426_v14, 2  ;;  %v1498_v18 = vpop.f32.mrb[11].mxu1  ;;  %v510_v14 = vlaneseq }
 0x23d   :  { %v457_v32 = vadd.f32 %v456_v22, %v455_v12 }
 0x23e   :  { %v471_v19 = vsel %vm468_vm7, %v469_v15, %v470_v16  ;;  %v502_v15 = vld [vmem:[%s2387_s2] sm:$0x1]  ;;  %s1728_s2 = smov 16  }
 0x23f   :  { %v431_v20 = vpop.f32.mrb[12].mxu1  ;;  %v483_v29 = vsel %vm445_vm5, %v471_v19, 0.0  ;;  %v458_v44 = vrot.slane %v457_v32, 2 }
 0x240   :  { %v472_v23 = vrot.slane %v431_v20, 2  ;;  %v1501_v24 = vpop.f32.mrb[13].mxu1  ;;  %v506_v20 = vld [vmem:[%s2388_s3] sm:$0x1]  ;;  %s1730_s3 = smov 32  }
 0x241   :  { %v459_v52 = vadd.f32 %v458_v44, %v457_v32  ;;  %v1697_v32 = vld [vmem:[%s2389_s4 + $0x80] sm:$0xff]   ;;  %v1703_v44 = vld [vmem:[%s2389_s4 + $0x10] sm:$0xff]  }
 0x242   :  { %v473_v28 = vsel %vm468_vm7, %v470_v16, %v472_v23  ;;  %v2059_v16 = vshrl.u32 %v510_v14, 7  ;;  %1509 = vmatpush3.bf16.msra.mxu0 %v1697_v32 }
 0x243   :  { %v484_v30 = vsel %vm445_vm5, %v473_v28, 0.0  ;;  %v436_v31 = vpop.f32.mrb[14].mxu1  ;;  %v460_v57 = vrot.slane %v459_v52, 1  ;;  %1510 = vmatprep.subr.bf16.mxu0 %v1727_v2 }
 0x244   :  { %v485_v34 = vadd.f32 %v484_v30, %v483_v29  ;;  %v474_v35 = vrot.slane %v436_v31, 2  ;;  %v1504_v39 = vpop.f32.mrb[15].mxu1  ;;  %v1695_v30 = vld [vmem:[%s2389_s4 + $0x40] sm:$0xff]  }
 0x245   :  { %v461_v61 = vadd.f32 %v460_v57, %v459_v52  ;;  %1379 = vmatprep.subr.bf16.mxu1 %v1695_v30  ;;  %v1696_v31 = vld [vmem:[%s2389_s4] sm:$0xff]   ;;  %v1700_v39 = vld [vmem:[%s2389_s4 + $0x8] sm:$0xff]   ;;  %v1713_v57 = vld [vmem:[%s2389_s4 + $0xb0] sm:$0xff]  }
 0x246   :  { %v475_v40 = vsel %vm468_vm7, %v472_v23, %v474_v35  ;;  %v2065_v23 = vsub.s32 0, %v2059_v16  ;;  %1380 = vmatpush3.bf16.msra.mxu1 %v1696_v31  ;;  %v1710_v52 = vld [vmem:[%s2389_s4 + $0xa8] sm:$0xff]  }
 0x247   :  { %v486_v41 = vsel %vm445_vm5, %v475_v40, 0.0  ;;  %v441_v43 = vpop.f32.mrb[16].mxu1  ;;  %v462_v4 = vmul.f32 0.001953125, %v461_v61  ;;  %v1702_v40 = vld [vmem:[%s2389_s4 + $0x90] sm:$0xff]   ;;  %v1716_v61 = vld [vmem:[%s2389_s4 + $0xb8] sm:$0xff]  }
 0x248   :  { %v487_v45 = vadd.f32 %v486_v41, %v485_v34  ;;  %v476_v47 = vrot.slane %v441_v43, 2  ;;  %v1507_v48 = vpop.f32.mrb[17].mxu1  ;;  %v1698_v34 = vld [vmem:[%s2389_s4 + $0x48] sm:$0xff]   ;;  %v1701_v41 = vld [vmem:[%s2389_s4 + $0x50] sm:$0xff]   ;;  %v1704_v43 = vld [vmem:[%s2389_s4 + $0x98] sm:$0xff]  }
 0x249   :  { %v499_v6 = vmul.f32 %v462_v4, %v462_v4  ;;  %1381 = vmatprep.subr.bf16.mxu1 %v1698_v34  ;;  %v1706_v48 = vld [vmem:[%s2389_s4 + $0x18] sm:$0xff]  }
 0x24a   :  { %v477_v49 = vsel %vm468_vm7, %v474_v35, %v476_v47  ;;  %v490_v55 = vsel %vm453_vm6, %v476_v47, 0.0  ;;  %v1699_v35 = vld [vmem:[%s2389_s4 + $0x88] sm:$0xff]   ;;  %1382 = vmatpush3.bf16.msra.mxu1 %v1700_v39  ;;  %v1707_v47 = vld [vmem:[%s2389_s4 + $0xa0] sm:$0xff]  }
 0x24b   :  { %v488_v51 = vsel %vm445_vm5, %v477_v49, 0.0  ;;  %1511 = vmatpush3.bf16.msra.mxu0 %v1699_v35  ;;  %1383 = vmatprep.subr.bf16.mxu1 %v1701_v41  ;;  %v1708_v49 = vld [vmem:[%s2389_s4 + $0x60] sm:$0xff]  }
 0x24c   :  { %v489_v53 = vadd.f32 %v488_v51, %v487_v45  ;;  %1512 = vmatprep.subr.bf16.mxu0 %v1727_v2  ;;  %v1705_v45 = vld [vmem:[%s2389_s4 + $0x58] sm:$0xff]   ;;  %v1709_v51 = vld [vmem:[%s2389_s4 + $0x20] sm:$0xff]  }
 0x24e   :  { %v491_v56 = vadd.f32 %v490_v55, %v489_v53  ;;  %1384 = vmatpush3.bf16.msra.mxu1 %v1703_v44  ;;  %v1711_v53 = vld [vmem:[%s2389_s4 + $0x68] sm:$0xff]   ;;  %v602_v44 = vsub.s32 1, %v2059_v16 }
 0x24f   :  { %1513 = vmatpush3.bf16.msra.mxu0 %v1702_v40  ;;  %1385 = vmatprep.subr.bf16.mxu1 %v1705_v45  ;;  %v1712_v55 = vld [vmem:[%s2389_s4 + $0x28] sm:$0xff]  }
 0x250   :  { %v492_v59 = vrot.slane %v491_v56, 4  ;;  %1514 = vmatprep.subr.bf16.mxu0 %v1727_v2 }
 0x252   :  { %v493_v60 = vadd.f32 %v492_v59, %v491_v56  ;;  %1386 = vmatpush3.bf16.msra.mxu1 %v1706_v48  ;;  %v1714_v56 = vld [vmem:[%s2389_s4 + $0x70] sm:$0xff]  }
 0x253   :  { %1515 = vmatpush3.bf16.msra.mxu0 %v1704_v43  ;;  %1387 = vmatprep.subr.bf16.mxu1 %v1708_v49  ;;  %v1715_v59 = vld [vmem:[%s2389_s4 + $0x30] sm:$0xff]  }
 0x254   :  { %v494_v62 = vrot.slane %v493_v60, 2  ;;  %1516 = vmatprep.subr.bf16.mxu0 %v1727_v2 }
 0x256   :  { %v495_v63 = vadd.f32 %v494_v62, %v493_v60  ;;  %1388 = vmatpush3.bf16.msra.mxu1 %v1709_v51  ;;  %v1717_v60 = vld [vmem:[%s2389_s4 + $0x78] sm:$0xff]  }
 0x257   :  { %1517 = vmatpush3.bf16.msra.mxu0 %v1707_v47  ;;  %1389 = vmatprep.subr.bf16.mxu1 %v1711_v53  ;;  %v1718_v62 = vld [vmem:[%s2389_s4 + $0x38] sm:$0xff]  }
 0x258   :  { %v496_v0 = vrot.slane %v495_v63, 1  ;;  %1518 = vmatprep.subr.bf16.mxu0 %v1727_v2 }
 0x25a   :  { %v497_v5 = vadd.f32 %v496_v0, %v495_v63  ;;  %1390 = vmatpush3.bf16.msra.mxu1 %v1712_v55 }
 0x25b   :  { %1519 = vmatpush3.bf16.msra.mxu0 %v1710_v52  ;;  %1391 = vmatprep.subr.bf16.mxu1 %v1714_v56 }
 0x25c   :  { %v498_v7 = vmul.f32 0.001953125, %v497_v5  ;;  %1520 = vmatprep.subr.bf16.mxu0 %v1727_v2 }
 0x25e   :  { %v500_v1 = vsub.f32 %v498_v7, %v499_v6  ;;  %1392 = vmatpush3.bf16.msra.mxu1 %v1715_v59 }
 0x25f   :  { %1521 = vmatpush3.bf16.msra.mxu0 %v1713_v57  ;;  %1393 = vmatprep.subr.bf16.mxu1 %v1717_v60 }
 0x260   :  { %v501_v11 = vmax.f32 %v500_v1, 0.0  ;;  %1522 = vmatprep.subr.bf16.mxu0 %v1727_v2 }
 0x262   :  { %v503_v12 = vadd.f32 1e-05, %v501_v11  ;;  %1394 = vmatpush3.bf16.msra.mxu1 %v1718_v62 }
 0x263   :  { %1523 = vmatpush3.bf16.msra.mxu0 %v1716_v61  ;;  %1643 = vmatprep.subr.bf16.mxu1 %v1725_v25 }
 0x264   :  { %1719 = vrsqrt.f32 %v503_v12  ;;  %1619 = vmatprep.subr.bf16.mxu0 %v1725_v25 }
 0x26e   :  { %v1720_v18 = vpop.eup %1719 }
 0x26f   :  { %v505_v19 = vmul.f32 %v1720_v18, %v502_v15 }
 0x271   :  { %v507_v22 = vmul.f32 %v505_v19, %v462_v4 }
 0x273   :  { %v508_v24 = vsub.f32 %v506_v20, %v507_v22 }
 0x275   :  { %v513_v28 = vrot.slane %v508_v24, %v2065_v23 }
 0x277   :  { %v2069_v29 = vsel %vm515_vm8, %v505_v19, %v513_v28 }
 0x278   :  { %521 = vrot.lane.b32.xlu0 %v2069_v29, %s1728_s2  ;;  %518 = vrot.lane.b32.xlu1 %v2069_v29, %s1729_s17 }
 0x27c   :  { %527 = vrot.lane.b32.xlu0 %v2069_v29, %s1730_s3  ;;  %524 = vrot.lane.b32.xlu1 %v2069_v29, %s1731_s18 }
 0x280   :  { %533 = vrot.lane.b32.xlu0 %v2069_v29, %s1732_s22  ;;  %530 = vrot.lane.b32.xlu1 %v2069_v29, %s1733_s23 }
 0x284   :  { %539 = vrot.lane.b32.xlu0 %v2069_v29, %s1724_s20  ;;  %536 = vrot.lane.b32.xlu1 %v2069_v29, %s1734_s8 }
 0x288   :  { %545 = vrot.lane.b32.xlu0 %v2069_v29, %s1735_s12  ;;  %542 = vrot.lane.b32.xlu1 %v2069_v29, %s1736_s13 }
 0x28c   :  { %551 = vrot.lane.b32.xlu0 %v2069_v29, %s1737_s15  ;;  %548 = vrot.lane.b32.xlu1 %v2069_v29, %s1738_s16 }
 0x290   :  { %557 = vrot.lane.b32.xlu0 %v2069_v29, %s1739_s27  ;;  %554 = vrot.lane.b32.xlu1 %v2069_v29, %s1740_s28 }
 0x294   :  { %560 = vrot.lane.b32.xlu1 %v2069_v29, %s1741_s7 }
 0x2ea   :  { %v522_v63 = vpop.permute.xlu0 %521  ;;  %v519_v4 = vpop.permute.xlu1 %518 }
 0x2eb   :  { %v563_v0 = vsel %vm445_vm5, %v2069_v29, %v519_v4 }
 0x2ec   :  { %v565_v6 = vsel %vm564_vm9, %v563_v0, %v522_v63 }
 0x2ee   :  { %v528_v5 = vpop.permute.xlu0 %527  ;;  %v525_v7 = vpop.permute.xlu1 %524 }
 0x2ef   :  { %v567_v1 = vsel %vm2393_vm10, %v565_v6, %v525_v7  ;;  %vm579_vm10 = vcmask 654336  }
 0x2f0   :  { %v569_v12 = vsel %vm2394_vm11, %v567_v1, %v528_v5  ;;  %vm581_vm11 = vcmask 719872  }
 0x2f2   :  { %v534_v11 = vpop.permute.xlu0 %533  ;;  %v531_v14 = vpop.permute.xlu1 %530 }
 0x2f3   :  { %v571_v15 = vsel %vm2395_vm12, %v569_v12, %v531_v14  ;;  %vm2402_vm12 = vcmask 785408  }
 0x2f4   :  { %v573_v19 = vsel %vm2396_vm13, %v571_v15, %v534_v11  ;;  %vm2401_vm13 = vcmask 850944  }
 0x2f6   :  { %v540_v18 = vpop.permute.xlu0 %539  ;;  %v537_v20 = vpop.permute.xlu1 %536 }
 0x2f7   :  { %v575_v22 = vsel %vm2398_vm14, %v573_v19, %v537_v20  ;;  %vm2399_vm14 = vcmask 982016  }
 0x2f8   :  { %v576_v28 = vsel %vm2397_vm2, %v575_v22, %v540_v18  ;;  %vm2400_vm2 = vcmask 916480  }
 0x2fa   :  { %v546_v24 = vpop.permute.xlu0 %545  ;;  %v543_v29 = vpop.permute.xlu1 %542 }
 0x2fb   :  { %v578_v30 = vsel %vm577_vm15, %v576_v28, %v543_v29 }
 0x2fc   :  { %v580_v32 = vsel %vm579_vm10, %v578_v30, %v546_v24 }
 0x2fe   :  { %v552_v31 = vpop.permute.xlu0 %551  ;;  %v549_v34 = vpop.permute.xlu1 %548 }
 0x2ff   :  { %v582_v35 = vsel %vm581_vm11, %v580_v32, %v549_v34 }
 0x300   :  { %v584_v39 = vsel %vm2402_vm12, %v582_v35, %v552_v31 }
 0x302   :  { %v555_v40 = vpop.permute.xlu1 %554  ;;  %v558_v41 = vpop.permute.xlu0 %557 }
 0x303   :  { %v586_v43 = vsel %vm2401_vm13, %v584_v39, %v555_v40 }
 0x304   :  { %v588_v45 = vsel %vm2400_vm2, %v586_v43, %v558_v41  ;;  %vm658_vm2 = vsmask.f32 1280 }
 0x305   :  { %vm659_vm12 = vmand %vm303_vm4, %vm658_vm2  ;;  %vm2405_vm2 = vcmask 326656  }
 0x306   :  { %v561_v47 = vpop.permute.xlu1 %560 }
 0x307   :  { %v590_v48 = vsel %vm2399_vm14, %v588_v45, %v561_v47  ;;  %vm627_vm14 = vsmask.f32 256 }
 0x308   :  { %v594_v49 = vrot.slane %v590_v48, %v2065_v23  ;;  %v603_v51 = vrot.slane %v590_v48, %v602_v44  ;;  %vm655_vm13 = vmand %vm515_vm8, %vm627_vm14 }
 0x30a   :  { %v595_v52 = vmul.f32 %v594_v49, %v1988_v9  ;;  %v596_v53 = vmul.f32 %v594_v49, %v1994_v13  ;;  %v597_v55 = vmul.f32 %v594_v49, %v2004_v21  ;;  %v598_v56 = vmul.f32 %v594_v49, %v2013_v27 }
 0x30b   :  { %v599_v57 = vmul.f32 %v594_v49, %v2024_v37 }
 0x30c   :  { %v604_v59 = vadd.f32 %v603_v51, %v595_v52  ;;  %v605_v60 = vadd.f32 %v603_v51, %v596_v53  ;;  %v606_v61 = vadd.f32 %v603_v51, %v597_v55  ;;  %v607_v62 = vadd.f32 %v603_v51, %v598_v56 }
 0x30d   :  { %v608_v63 = vadd.f32 %v603_v51, %v599_v57 }
 0x30e   :  { %v609_v4 = vmul.f32 0.01, %v604_v59  ;;  %v610_v0 = vmul.f32 0.01, %v605_v60  ;;  %v611_v5 = vmul.f32 0.01, %v606_v61 }
 0x30f   :  { %v612_v6 = vmul.f32 0.01, %v607_v62  ;;  %v613_v7 = vmul.f32 0.01, %v608_v63 }
 0x310   :  { %v614_v1 = vmax.f32 %v604_v59, %v609_v4  ;;  %v615_v9 = vmax.f32 %v605_v60, %v610_v0  ;;  %v616_v11 = vmax.f32 %v606_v61, %v611_v5 }
 0x311   :  { %v617_v13 = vmax.f32 %v607_v62, %v612_v6  ;;  %v618_v12 = vmax.f32 %v608_v63, %v613_v7 }
 0x312   :  { %v619_v21 = vmul.f32 %v614_v1, %v1986_v3  ;;  %v620_v27 = vmul.f32 %v615_v9, %v1990_v10  ;;  %v621_v37 = vmul.f32 %v616_v11, %v1999_v17 }
 0x313   :  { %v622_v14 = vmul.f32 %v617_v13, %v2011_v26  ;;  %v623_v15 = vmul.f32 %v618_v12, %v2022_v36 }
 0x314   :  { %v624_v18 = vpack.c.bf16 %v620_v27, %v619_v21 }
 0x315   :  { %v625_v19 = vpack.c.bf16 %v622_v14, %v621_v37  ;;  %v626_v20 = vpack.c.bf16 %v623_v15, %v623_v15 }
 0x316   :  { %v629_v22 = vshrl.u32 %v624_v18, 16  ;;  %v632_v30 = vshll.u32 %v624_v18, 16 }
 0x317   :  { %v636_v24 = vshrl.u32 %v625_v19, 16  ;;  %v644_v28 = vshrl.u32 %v626_v20, 16  ;;  %v639_v32 = vshll.u32 %v625_v19, 16  ;;  %v647_v35 = vshll.u32 %v626_v20, 16 }
 0x318   :  { %v631_v29 = vrot.slane %v629_v22, 7 }
 0x319   :  { %v638_v31 = vrot.slane %v636_v24, 7  ;;  %v646_v34 = vrot.slane %v644_v28, 7 }
 0x31a   :  { %v634_v39 = vor.u32 %v632_v30, %v631_v29 }
 0x31b   :  { %v641_v40 = vor.u32 %v639_v32, %v638_v31  ;;  %v649_v41 = vor.u32 %v647_v35, %v646_v34 }
 0x31c   :  { %v656_v43 = vsel %vm655_vm13, 0, %v634_v39 }
 0x31d   :  { %v642_v45 = vsel %vm627_vm14, %v631_v29, %v641_v40  ;;  %v689_v47 = vrot.slane %v656_v43, 1  ;;  %v664_v48 = vshll.u32 %v656_v43, 16  ;;  %v650_v52 = vsel %vm627_vm14, %v638_v31, %v649_v41 }
 0x31e   :  { %v690_v49 = vrot.slane %v642_v45, 1  ;;  %v669_v51 = vshll.u32 %v642_v45, 16  ;;  %v662_v53 = vshrl.u32 %v656_v43, 16  ;;  %v660_v56 = vsel %vm659_vm12, %v650_v52, 0 }
 0x31f   :  { %v666_v55 = vrot.slane %v664_v48, 1  ;;  %v673_v57 = vshrl.u32 %v642_v45, 16  ;;  %v677_v61 = vshll.u32 %v660_v56, 16  ;;  %v692_v62 = vrot.slane %v660_v56, 1 }
 0x320   :  { %v691_v59 = vsel %vm111_vm1, %v689_v47, %v690_v49  ;;  %v671_v60 = vrot.slane %v669_v51, 1  ;;  %v681_v1 = vshrl.u32 %v660_v56, 16 }
 0x321   :  { %1525 = vmatmul.mubr.bf16.vlgmr.msra.gmra.mrb[12].mxu0 %v691_v59  ;;  %v667_v63 = vor.u32 %v666_v55, %v662_v53  ;;  %v679_v0 = vrot.slane %v677_v61, 1  ;;  %v693_v5 = vsel %vm111_vm1, %v690_v49, %v692_v62  ;;  %vm2404_vm1 = vcmask 261120  }
 0x322   :  { %v675_v4 = vor.u32 %v673_v57, %v671_v60  ;;  %1528 = vmatprep.mubr.msk.bf16.mxu0 %vm1726_vm3, %v1727_v2  ;;  %1621 = vmatpush3.bf16.msra.mxu0 %v1865_v33 }
 0x323   :  { %v672_v6 = vsel %vm81_vm0, %v667_v63, %v671_v60  ;;  %1622 = vmatprep.subr.bf16.mxu0 %v1725_v25  ;;  %v683_v9 = vor.u32 %v681_v1, %v679_v0 }
 0x324   :  { %921 = vmatprep.mubr.bf16.mxu1 %v672_v6  ;;  %v680_v7 = vsel %vm81_vm0, %v675_v4, %v679_v0  ;;  %vm2403_vm0 = vcmask 195584  }
 0x325   :  { %922 = vmatmul.mubr.bf16.vlgmr.msra.gmra.mrb[20].mxu1 %v656_v43 }
 0x326   :  { %929 = vmatprep.mubr.bf16.mxu1 %v680_v7  ;;  %1624 = vmatpush3.bf16.msra.mxu0 %v1881_v38 }
 0x327   :  { %1625 = vmatprep.subr.bf16.mxu0 %v1725_v25  ;;  %1651 = vmatpush3.bf16.msra.mxu1 %v1865_v33 }
 0x328   :  { %1644 = vmatprep.subr.bf16.mxu1 %v1725_v25 }
 0x329   :  { %1529 = vmatmul.mubr.bf16.gmra.mrb[16].mxu0 %v693_v5 }
 0x32a   :  { %1532 = vmatprep.mubr.msk.bf16.mxu0 %vm1726_vm3, %v1727_v2  ;;  %1627 = vmatpush3.bf16.msra.mxu0 %v1895_v42 }
 0x32b   :  { %1628 = vmatprep.subr.bf16.mxu0 %v1725_v25  ;;  %1652 = vmatpush3.bf16.msra.mxu1 %v1881_v38 }
 0x32c   :  { %1645 = vmatprep.subr.bf16.mxu1 %v1725_v25 }
 0x32d   :  { %930 = vmatmul.mubr.bf16.gmra.mrb[24].mxu1 %v642_v45 }
 0x32e   :  { %937 = vmatprep.mubr.bf16.mxu1 %v683_v9  ;;  %1630 = vmatpush3.bf16.msra.mxu0 %v1909_v46 }
 0x32f   :  { %1631 = vmatprep.subr.bf16.mxu0 %v1725_v25  ;;  %1653 = vmatpush3.bf16.msra.mxu1 %v1895_v42 }
 0x330   :  { %1646 = vmatprep.subr.bf16.mxu1 %v1725_v25 }
 0x331   :  { %1533 = vmatmul.mubr.bf16.gmra.mrb[20].mxu0 %v692_v62 }
 0x332   :  { %1633 = vmatpush3.bf16.msra.mxu0 %v1923_v50  ;;  %1568 = vmatprep.mubr.msk.f32.mxu0 %vm1726_vm3, %v1727_v2 }
 0x333   :  { %1634 = vmatprep.subr.bf16.mxu0 %v1725_v25  ;;  %1654 = vmatpush3.bf16.msra.mxu1 %v1909_v46 }
 0x334   :  { %1647 = vmatprep.subr.bf16.mxu1 %v1725_v25 }
 0x335   :  { %938 = vmatmul.mubr.bf16.gmra.mrb[28].mxu1 %v660_v56 }
 0x336   :  { %1636 = vmatpush3.bf16.msra.mxu0 %v1937_v54  ;;  %1577 = vmatprep.mubr.msk.f32.mxu1 %vm1726_vm3, %v1727_v2 }
 0x337   :  { %1637 = vmatprep.subr.bf16.mxu0 %v1725_v25  ;;  %1655 = vmatpush3.bf16.msra.mxu1 %v1923_v50 }
 0x338   :  { %1648 = vmatprep.subr.bf16.mxu1 %v1725_v25 }
 0x33a   :  { %1639 = vmatpush3.bf16.msra.mxu0 %v1951_v58 }
 0x33b   :  { %1640 = vmatprep.subr.bf16.mxu0 %v1725_v25  ;;  %1656 = vmatpush3.bf16.msra.mxu1 %v1937_v54 }
 0x33c   :  { %1649 = vmatprep.subr.bf16.mxu1 %v1725_v25 }
 0x33e   :  { %1642 = vmatpush3.bf16.msra.mxu0 %v1978_v8 }
 0x33f   :  { %1657 = vmatpush3.bf16.msra.mxu1 %v1951_v58 }
 0x340   :  { %1650 = vmatprep.subr.bf16.mxu1 %v1725_v25 }
 0x343   :  { %1658 = vmatpush3.bf16.msra.mxu1 %v1978_v8 }
 0x3f4   :  { %v979_v33 = vpop.f32.mrb[12].mxu0 }
 0x3f5   :  { %v1526_v38 = vpop.f32.mrb[13].mxu0 }
 0x3f6   :  { %v982_v42 = vpop.f32.mrb[14].mxu0 }
 0x3f7   :  { %v1527_v46 = vpop.f32.mrb[15].mxu0 }
 0x3f8   :  { %v1395_v50 = vpop.f32.mrb[20].mxu1 }
 0x3f9   :  { %v1396_v11 = vpop.f32.mrb[21].mxu1 }
 0x3fa   :  { %v1397_v13 = vadd.f32 %v1396_v11, %v1395_v50  ;;  %v1398_v12 = vpop.f32.mrb[22].mxu1 }
 0x3fb   :  { %v1399_v21 = vpop.f32.mrb[23].mxu1 }
 0x3fc   :  { %v2259_v54 = vadd.f32 %v1397_v13, %v979_v33  ;;  %v1400_v27 = vadd.f32 %v1399_v21, %v1398_v12  ;;  %v987_v37 = vpop.f32.mrb[16].mxu0 }
 0x3fd   :  { %v1530_v14 = vpop.f32.mrb[17].mxu0 }
 0x3fe   :  { %v1001_v58 = vmul.f32 %v2259_v54, %v1986_v3  ;;  %v2263_v25 = vadd.f32 %v1400_v27, %v982_v42  ;;  %v990_v8 = vpop.f32.mrb[18].mxu0 }
 0x3ff   :  { %v1531_v15 = vpop.f32.mrb[19].mxu0 }
 0x400   :  { %v1401_v18 = vpop.f32.mrb[24].mxu1  ;;  %1569 = vmatmul.mubr.f32.vlgmr.msra.gmra.mrb[24].mxu0 %v1001_v58  ;;  %v1002_v24 = vmul.f32 %v2263_v25, %v1990_v10  ;;  %v1006_v49 = vmul.f32 %v1001_v58, %v2259_v54 }
 0x401   :  { %v1402_v19 = vpop.f32.mrb[25].mxu1  ;;  %1571 = vmatprep.mubr.msk.f32.mxu0 %vm1726_vm3, %v1727_v2 }
 0x402   :  { %v1403_v20 = vadd.f32 %v1402_v19, %v1401_v18  ;;  %v1404_v22 = vpop.f32.mrb[26].mxu1  ;;  %v1007_v52 = vmul.f32 %v1002_v24, %v2263_v25  ;;  %v1016_v56 = vrot.slane %v1006_v49, 6 }
 0x403   :  { %v1405_v28 = vpop.f32.mrb[27].mxu1 }
 0x404   :  { %v2269_v29 = vadd.f32 %v1403_v20, %v987_v37  ;;  %v1406_v30 = vadd.f32 %v1405_v28, %v1404_v22  ;;  %v995_v31 = vpop.f32.mrb[20].mxu0  ;;  %1572 = vmatmul.mubr.f32.gmra.mrb[26].mxu0 %v1002_v24  ;;  %v1017_v60 = vrot.slane %v1007_v52, 6 }
 0x405   :  { %v1534_v32 = vpop.f32.mrb[21].mxu0  ;;  %1574 = vmatprep.mubr.msk.f32.mxu0 %vm1726_vm3, %v1727_v2 }
 0x406   :  { %v2273_v34 = vadd.f32 %v1406_v30, %v990_v8  ;;  %v998_v35 = vpop.f32.mrb[22].mxu0  ;;  %v1003_v39 = vmul.f32 %v2269_v29, %v1999_v17  ;;  %v1018_v61 = vsel %vm303_vm4, %v1016_v56, %v1017_v60 }
 0x407   :  { %v1535_v40 = vpop.f32.mrb[23].mxu0 }
 0x408   :  { %v1004_v41 = vmul.f32 %v2273_v34, %v2011_v26  ;;  %v1407_v43 = vpop.f32.mrb[28].mxu1  ;;  %1575 = vmatmul.mubr.f32.gmra.mrb[28].mxu0 %v1003_v39  ;;  %v1008_v57 = vmul.f32 %v1003_v39, %v2269_v29 }
 0x409   :  { %v1408_v45 = vpop.f32.mrb[29].mxu1 }
 0x40a   :  { %v1409_v47 = vadd.f32 %v1408_v45, %v1407_v43  ;;  %v1410_v48 = vpop.f32.mrb[30].mxu1  ;;  %1578 = vmatmul.mubr.f32.vlgmr.msra.gmra.mrb[18].mxu1 %v1004_v41  ;;  %v1019_v62 = vrot.slane %v1008_v57, 6  ;;  %v1009_v63 = vmul.f32 %v1004_v41, %v2273_v34 }
 0x40b   :  { %v1411_v51 = vpop.f32.mrb[31].mxu1  ;;  %1580 = vmatprep.mubr.msk.f32.mxu1 %vm1726_vm3, %v1727_v2 }
 0x40c   :  { %v2283_v53 = vadd.f32 %v1409_v47, %v995_v31  ;;  %v1020_v4 = vsel %vm303_vm4, %v1017_v60, %v1019_v62  ;;  %v1021_v0 = vrot.slane %v1009_v63, 6 }
 0x40e   :  { %v1005_v55 = vmul.f32 %v2283_v53, %v2022_v36  ;;  %v1022_v6 = vsel %vm303_vm4, %v1019_v62, %v1021_v0 }
 0x410   :  { %v1030_v59 = vsel %vm303_vm4, %v1005_v55, %v1016_v56  ;;  %v1010_v5 = vmul.f32 %v1005_v55, %v2283_v53 }
 0x411   :  { %1581 = vmatmul.mubr.f32.gmra.mrb[32].mxu1 %v1030_v59 }
 0x412   :  { %1583 = vmatprep.mubr.msk.f32.mxu1 %vm1726_vm3, %v1727_v2  ;;  %v1023_v7 = vrot.slane %v1010_v5, 6 }
 0x414   :  { %v1024_v1 = vsel %vm303_vm4, %v1021_v0, %v1023_v7  ;;  %vm2407_vm4 = vcmask 457728  }
 0x415   :  { %1584 = vmatmul.mubr.f32.gmra.mrb[34].mxu1 %v1018_v61 }
 0x416   :  { %1586 = vmatprep.mubr.msk.f32.mxu1 %vm1726_vm3, %v1727_v2 }
 0x419   :  { %1587 = vmatmul.mubr.f32.gmra.mrb[36].mxu1 %v1020_v4 }
 0x41a   :  { %1589 = vmatprep.mubr.msk.f32.mxu1 %vm1726_vm3, %v1727_v2 }
 0x41d   :  { %1590 = vmatmul.mubr.f32.gmra.mrb[38].mxu1 %v1022_v6 }
 0x41e   :  { %1592 = vmatprep.mubr.msk.f32.mxu1 %vm1726_vm3, %v1727_v2  ;;  %vm2406_vm3 = vcmask 392192  }
 0x421   :  { %1593 = vmatmul.mubr.f32.gmra.mrb[40].mxu1 %v1024_v1 }
 0x4d3   :  { %v1097_v9 = vpop.f32.mrb[24].mxu0 }
 0x4d4   :  { %v1570_v33 = vpop.f32.mrb[25].mxu0  ;;  %v1141_v42 = vsel %vm445_vm5, %v1097_v9, 0.0 }
 0x4d7   :  { %v1102_v38 = vpop.f32.mrb[26].mxu0 }
 0x4d8   :  { %v1142_v46 = vsel %vm445_vm5, %v1102_v38, 0.0  ;;  %v1573_v50 = vpop.f32.mrb[27].mxu0 }
 0x4d9   :  { %v1143_v11 = vadd.f32 %v1142_v46, %v1141_v42 }
 0x4db   :  { %v1107_v13 = vpop.f32.mrb[28].mxu0 }
 0x4dc   :  { %v1144_v12 = vsel %vm445_vm5, %v1107_v13, 0.0  ;;  %v1576_v21 = vpop.f32.mrb[29].mxu0 }
 0x4dd   :  { %v1145_v27 = vadd.f32 %v1144_v12, %v1143_v11  ;;  %v1112_v37 = vpop.f32.mrb[18].mxu1 }
 0x4de   :  { %v1146_v2 = vsel %vm445_vm5, %v1112_v37, 0.0  ;;  %v1579_v14 = vpop.f32.mrb[19].mxu1 }
 0x4df   :  { %v1147_v58 = vadd.f32 %v1146_v2, %v1145_v27  ;;  %v1195_v2 = vld [vmem:[%s2390_s5] sm:$0x1] }
 0x4e4   :  { %v1117_v8 = vpop.f32.mrb[32].mxu1 }
 0x4e5   :  { %v1148_v15 = vsel %vm453_vm6, %v1117_v8, 0.0  ;;  %v1582_v18 = vpop.f32.mrb[33].mxu1  ;;  %v1162_v22 = vrot.slane %v1117_v8, 2  ;;  %v1199_v8 = vld [vmem:[%s2391_s6] sm:$0x1] }
 0x4e6   :  { %v1149_v19 = vadd.f32 %v1148_v15, %v1147_v58 }
 0x4e8   :  { %v1122_v20 = vpop.f32.mrb[34].mxu1  ;;  %v1150_v32 = vrot.slane %v1149_v19, 4 }
 0x4e9   :  { %v1163_v24 = vrot.slane %v1122_v20, 2  ;;  %v1585_v28 = vpop.f32.mrb[35].mxu1 }
 0x4ea   :  { %v1151_v47 = vadd.f32 %v1150_v32, %v1149_v19 }
 0x4eb   :  { %v1164_v30 = vsel %vm468_vm7, %v1162_v22, %v1163_v24 }
 0x4ec   :  { %v1127_v31 = vpop.f32.mrb[36].mxu1  ;;  %v1176_v41 = vsel %vm445_vm5, %v1164_v30, 0.0  ;;  %v1152_v57 = vrot.slane %v1151_v47, 2 }
 0x4ed   :  { %v1165_v35 = vrot.slane %v1127_v31, 2  ;;  %v1588_v39 = vpop.f32.mrb[37].mxu1 }
 0x4ee   :  { %v1153_v4 = vadd.f32 %v1152_v57, %v1151_v47 }
 0x4ef   :  { %v1166_v40 = vsel %vm468_vm7, %v1163_v24, %v1165_v35 }
 0x4f0   :  { %v1177_v43 = vsel %vm445_vm5, %v1166_v40, 0.0  ;;  %v1132_v45 = vpop.f32.mrb[38].mxu1  ;;  %v1154_v7 = vrot.slane %v1153_v4, 1 }
 0x4f1   :  { %v1178_v48 = vadd.f32 %v1177_v43, %v1176_v41  ;;  %v1167_v49 = vrot.slane %v1132_v45, 2  ;;  %v1591_v51 = vpop.f32.mrb[39].mxu1 }
 0x4f2   :  { %v1155_v33 = vadd.f32 %v1154_v7, %v1153_v4 }
 0x4f3   :  { %v1168_v52 = vsel %vm468_vm7, %v1165_v35, %v1167_v49 }
 0x4f4   :  { %v1179_v55 = vsel %vm445_vm5, %v1168_v52, 0.0  ;;  %v1137_v56 = vpop.f32.mrb[40].mxu1  ;;  %v1156_v46 = vmul.f32 0.001953125, %v1155_v33 }
 0x4f5   :  { %v1180_v59 = vadd.f32 %v1179_v55, %v1178_v48  ;;  %v1169_v60 = vrot.slane %v1137_v56, 2  ;;  %v1594_v61 = vpop.f32.mrb[41].mxu1 }
 0x4f6   :  { %v1192_v13 = vmul.f32 %v1156_v46, %v1156_v46 }
 0x4f7   :  { %v1170_v62 = vsel %vm468_vm7, %v1167_v49, %v1169_v60  ;;  %v1183_v5 = vsel %vm453_vm6, %v1169_v60, 0.0  ;;  %vm2409_vm6 = vcmask 785408   ;;  %vm2410_vm7 = vcmask 850944  }
 0x4f8   :  { %v1181_v63 = vsel %vm445_vm5, %v1170_v62, 0.0 }
 0x4f9   :  { %v1182_v0 = vadd.f32 %v1181_v63, %v1180_v59 }
 0x4fb   :  { %v1184_v6 = vadd.f32 %v1183_v5, %v1182_v0 }
 0x4fd   :  { %v1185_v1 = vrot.slane %v1184_v6, 4 }
 0x4ff   :  { %v1186_v9 = vadd.f32 %v1185_v1, %v1184_v6 }
 0x501   :  { %v1187_v38 = vrot.slane %v1186_v9, 2 }
 0x503   :  { %v1188_v42 = vadd.f32 %v1187_v38, %v1186_v9 }
 0x505   :  { %v1189_v50 = vrot.slane %v1188_v42, 1 }
 0x507   :  { %v1190_v11 = vadd.f32 %v1189_v50, %v1188_v42 }
 0x509   :  { %v1191_v12 = vmul.f32 0.001953125, %v1190_v11 }
 0x50b   :  { %v1193_v21 = vsub.f32 %v1191_v12, %v1192_v13 }
 0x50d   :  { %v1194_v27 = vmax.f32 %v1193_v21, 0.0 }
 0x50f   :  { %v1196_v37 = vadd.f32 1e-05, %v1194_v27 }
 0x511   :  { %1721 = vrsqrt.f32 %v1196_v37 }
 0x51b   :  { %v1722_v14 = vpop.eup %1721 }
 0x51c   :  { %v1198_v58 = vmul.f32 %v1722_v14, %v1195_v2 }
 0x51e   :  { %v1200_v15 = vmul.f32 %v1198_v58, %v1156_v46 }
 0x520   :  { %v1201_v18 = vsub.f32 %v1199_v8, %v1200_v15 }
 0x522   :  { %v1206_v19 = vrot.slane %v1201_v18, %v2065_v23 }
 0x524   :  { %v1208_v20 = vsel %vm515_vm8, %v1198_v58, %v1206_v19  ;;  %vm2411_vm8 = vcmask 916480  }
 0x525   :  { %1213 = vrot.lane.b32.xlu1 %v1208_v20, %s1728_s2  ;;  %1210 = vrot.lane.b32.xlu0 %v1208_v20, %s1729_s17 }
 0x529   :  { %1219 = vrot.lane.b32.xlu1 %v1208_v20, %s1730_s3  ;;  %1216 = vrot.lane.b32.xlu0 %v1208_v20, %s1731_s18 }
 0x52d   :  { %1225 = vrot.lane.b32.xlu1 %v1208_v20, %s1732_s22  ;;  %1222 = vrot.lane.b32.xlu0 %v1208_v20, %s1733_s23 }
 0x531   :  { %1231 = vrot.lane.b32.xlu1 %v1208_v20, %s1724_s20  ;;  %1228 = vrot.lane.b32.xlu0 %v1208_v20, %s1734_s8 }
 0x535   :  { %1237 = vrot.lane.b32.xlu1 %v1208_v20, %s1735_s12  ;;  %1234 = vrot.lane.b32.xlu0 %v1208_v20, %s1736_s13 }
 0x539   :  { %1243 = vrot.lane.b32.xlu1 %v1208_v20, %s1737_s15  ;;  %1240 = vrot.lane.b32.xlu0 %v1208_v20, %s1738_s16 }
 0x53d   :  { %1249 = vrot.lane.b32.xlu1 %v1208_v20, %s1739_s27  ;;  %1246 = vrot.lane.b32.xlu0 %v1208_v20, %s1740_s28 }
 0x541   :  { %1252 = vrot.lane.b32.xlu0 %v1208_v20, %s1741_s7 }
 0x597   :  { %v1214_v22 = vpop.permute.xlu1 %1213  ;;  %v1211_v24 = vpop.permute.xlu0 %1210 }
 0x598   :  { %v1255_v28 = vsel %vm445_vm5, %v1208_v20, %v1211_v24  ;;  %vm2408_vm5 = vcmask 523264  }
 0x599   :  { %v1256_v31 = vsel %vm564_vm9, %v1255_v28, %v1214_v22  ;;  %vm2412_vm9 = vcmask 982016  }
 0x59b   :  { %v1220_v30 = vpop.permute.xlu1 %1219  ;;  %v1217_v32 = vpop.permute.xlu0 %1216 }
 0x59c   :  { %v1257_v35 = vsel %vm2403_vm0, %v1256_v31, %v1217_v32 }
 0x59d   :  { %v1258_v40 = vsel %vm2404_vm1, %v1257_v35, %v1220_v30 }
 0x59f   :  { %v1226_v39 = vpop.permute.xlu1 %1225  ;;  %v1223_v41 = vpop.permute.xlu0 %1222 }
 0x5a0   :  { %v1259_v43 = vsel %vm2405_vm2, %v1258_v40, %v1223_v41 }
 0x5a1   :  { %v1260_v47 = vsel %vm2406_vm3, %v1259_v43, %v1226_v39 }
 0x5a3   :  { %v1232_v45 = vpop.permute.xlu1 %1231  ;;  %v1229_v48 = vpop.permute.xlu0 %1228 }
 0x5a4   :  { %v1261_v49 = vsel %vm2407_vm4, %v1260_v47, %v1229_v48 }
 0x5a5   :  { %v1262_v52 = vsel %vm2408_vm5, %v1261_v49, %v1232_v45 }
 0x5a7   :  { %v1238_v51 = vpop.permute.xlu1 %1237  ;;  %v1235_v55 = vpop.permute.xlu0 %1234 }
 0x5a8   :  { %v1263_v56 = vsel %vm577_vm15, %v1262_v52, %v1235_v55 }
 0x5a9   :  { %v1264_v59 = vsel %vm579_vm10, %v1263_v56, %v1238_v51 }
 0x5ab   :  { %v1244_v57 = vpop.permute.xlu1 %1243  ;;  %v1241_v60 = vpop.permute.xlu0 %1240 }
 0x5ac   :  { %v1265_v61 = vsel %vm581_vm11, %v1264_v59, %v1241_v60 }
 0x5ad   :  { %v1266_v62 = vsel %vm2409_vm6, %v1265_v61, %v1244_v57 }
 0x5af   :  { %v1247_v63 = vpop.permute.xlu0 %1246  ;;  %v1250_v4 = vpop.permute.xlu1 %1249 }
 0x5b0   :  { %v1267_v0 = vsel %vm2410_vm7, %v1266_v62, %v1247_v63 }
 0x5b1   :  { %v1268_v5 = vsel %vm2411_vm8, %v1267_v0, %v1250_v4 }
 0x5b3   :  { %v1253_v6 = vpop.permute.xlu0 %1252 }
 0x5b4   :  { %v1269_v7 = vsel %vm2412_vm9, %v1268_v5, %v1253_v6 }
 0x5b5   :  { %v1273_v1 = vrot.slane %v1269_v7, %v2065_v23  ;;  %v1282_v9 = vrot.slane %v1269_v7, %v602_v44 }
 0x5b7   :  { %v1274_v33 = vmul.f32 %v1273_v1, %v2259_v54  ;;  %v1275_v38 = vmul.f32 %v1273_v1, %v2263_v25  ;;  %v1276_v42 = vmul.f32 %v1273_v1, %v2269_v29  ;;  %v1277_v46 = vmul.f32 %v1273_v1, %v2273_v34 }
 0x5b8   :  { %v1278_v50 = vmul.f32 %v1273_v1, %v2283_v53 }
 0x5b9   :  { %v1283_v11 = vadd.f32 %v1282_v9, %v1274_v33  ;;  %v1284_v13 = vadd.f32 %v1282_v9, %v1275_v38  ;;  %v1285_v12 = vadd.f32 %v1282_v9, %v1276_v42  ;;  %v1286_v21 = vadd.f32 %v1282_v9, %v1277_v46 }
 0x5ba   :  { %v1287_v27 = vadd.f32 %v1282_v9, %v1278_v50 }
 0x5bb   :  { %v1288_v37 = vmul.f32 0.01, %v1283_v11  ;;  %v1289_v23 = vmul.f32 0.01, %v1284_v13  ;;  %v1290_v2 = vmul.f32 0.01, %v1285_v12 }
 0x5bc   :  { %v1291_v16 = vmul.f32 0.01, %v1286_v21  ;;  %v1292_v44 = vmul.f32 0.01, %v1287_v27 }
 0x5bd   :  { %v1293_v14 = vmax.f32 %v1283_v11, %v1288_v37  ;;  %v1294_v54 = vmax.f32 %v1284_v13, %v1289_v23  ;;  %v1295_v58 = vmax.f32 %v1285_v12, %v1290_v2 }
 0x5be   :  { %v1296_v25 = vmax.f32 %v1286_v21, %v1291_v16  ;;  %v1297_v8 = vmax.f32 %v1287_v27, %v1292_v44 }
 0x5bf   :  { %v1298_v29 = vmul.f32 %v1293_v14, %v1986_v3  ;;  %v1299_v34 = vmul.f32 %v1294_v54, %v1990_v10  ;;  %v1300_v53 = vmul.f32 %v1295_v58, %v1999_v17 }
 0x5c0   :  { %v1301_v15 = vmul.f32 %v1296_v25, %v2011_v26  ;;  %v1302_v18 = vmul.f32 %v1297_v8, %v2022_v36 }
 0x5c1   :  { %1303 = vst [vmem:[%s2392_s9] sm:$0xff] %v1298_v29  ;;  %1304 = vst [vmem:[%s2392_s9 + $0x8] sm:$0xff] %v1299_v34 }
 0x5c2   :  { %1305 = vst [vmem:[%s2392_s9 + $0x10] sm:$0xff] %v1300_v53  ;;  %1306 = vst [vmem:[%s2392_s9 + $0x18] sm:$0xff] %v1301_v15 }
 0x5c3   :  { %1307 = vst [vmem:[%s2392_s9 + $0x20] sm:$0x3] %v1302_v18 }

</bundles_post_ra>
